<compile_context>
chip_gen: v7x
topology: tpu7x:2x2x1
jax: 0.10.0
libtpu: 0.0.40
codegen_flags: <defaults>
</compile_context>

<pallas_src>
import jax
import jax.numpy as jnp
from jax.experimental import pallas as pl
from jax.experimental.pallas import tpu as pltpu  # noqa: F401  (TPU backend)


def _softmax_gram_kernel(ys_ref, yw_ref, gs_ref, gw_ref):
    B, C = ys_ref.shape

    def gram_of_softmax(y_ref):
        # Numerically stable row-wise softmax over the class axis (axis=1).
        x = y_ref[...].astype(jnp.float32)
        m = jnp.max(x, axis=1, keepdims=True)
        e = jnp.exp(x - m)
        denom = jnp.sum(e, axis=1, keepdims=True)
        # EUP approximate reciprocal + one Newton step -> ~f32-exact divide
        # in a bundle slot the VALU does not own.
        inv = pl.reciprocal(denom, approx=True)
        inv = inv * (2.0 - denom * inv)
        p = e * inv
        # Gram over the smaller dimension: its eigenvalues are exactly the
        # squared singular values of P (min(B, C) of them).  MXU matmul, no
        # transpose materialized (shapes are static -> Python branch is fine).
        if B <= C:
            dims = (((1,), (1,)), ((), ()))   # P @ P^T   -> (B, B)
        else:
            dims = (((0,), (0,)), ((), ()))   # P^T @ P   -> (C, C)
        return jax.lax.dot_general(p, p, dims,
                                   preferred_element_type=jnp.float32)

    gs_ref[...] = gram_of_softmax(ys_ref)
    gw_ref[...] = gram_of_softmax(yw_ref)


def softmax_grams_pallas(y_strong, y):
    """Fused kernel: softmax both (B, C) logit matrices in VMEM and return
    their (K, K) Gram matrices, K = min(B, C)."""
    B, C = y_strong.shape
    assert y.shape == (B, C), "y_strong and y must have identical shapes"
    K = min(B, C)
    gram_shape = jax.ShapeDtypeStruct((K, K), jnp.float32)
    return pl.pallas_call(
        _softmax_gram_kernel,
        out_shape=(gram_shape, gram_shape),
        # Full-array blocks on a 0-d grid: one VMEM tile per operand/result.
        in_specs=[pl.BlockSpec((B, C), lambda: (0, 0)),
                  pl.BlockSpec((B, C), lambda: (0, 0))],
        out_specs=(pl.BlockSpec((K, K), lambda: (0, 0)),
                   pl.BlockSpec((K, K), lambda: (0, 0))),
    )(y_strong, y)


def _nuclear_norm_mean_from_gram(g):
    # svdvals(P) = sqrt(eigvalsh(P P^T)); clamp tiny negative eigenvalues
    # produced by round-off.
    ev = jnp.linalg.eigvalsh(g)
    return jnp.mean(jnp.sqrt(jnp.clip(ev, 0.0, None)))


def batch_nuclear_norm_maximization(y_strong, y):
    """Forward pass of BatchNuclearNormMaximization. Returns a scalar."""
    g_strong, g_weak = softmax_grams_pallas(y_strong, y)
    # TODO(synk): the K x K symmetric eigendecomposition (iterative algorithm)
    # has no clean Pallas equivalent; it runs in plain JAX on the tiny Gram
    # matrices produced by the kernel.
    transfer_loss_1 = -_nuclear_norm_mean_from_gram(g_strong)
    transfer_loss_2 = -_nuclear_norm_mean_from_gram(g_weak)
    return 0.1 * transfer_loss_1 + transfer_loss_2


def _reference(y_strong, y):
    p_s = jax.nn.softmax(y_strong.astype(jnp.float32), axis=1)
    p_w = jax.nn.softmax(y.astype(jnp.float32), axis=1)
    s1 = jnp.linalg.svd(p_s, compute_uv=False)
    s2 = jnp.linalg.svd(p_w, compute_uv=False)
    return 0.1 * (-jnp.mean(s1)) + (-jnp.mean(s2))


if __name__ == "__main__":
    # Small shapes consistent with the module: (minibatch, num_classes).
    B, C = 8, 32
    key = jax.random.PRNGKey(0)
    k1, k2 = jax.random.split(key)
    y_strong = jax.random.normal(k1, (B, C), dtype=jnp.float32)
    y = jax.random.normal(k2, (B, C), dtype=jnp.float32)

    loss = jax.block_until_ready(
        jax.jit(batch_nuclear_norm_maximization)(y_strong, y)
    )
    ref = jax.block_until_ready(_reference(y_strong, y))

    assert jnp.isfinite(loss), "loss is not finite"
    # sqrt(eigvalsh(Gram)) and full-SVD singular values agree to ~1e-6; the
    # extra slack over 1e-5 covers that plus the NR-refined reciprocal.
    assert jnp.allclose(loss, ref, atol=3e-5, rtol=3e-5), (loss, ref)
    print("KERNEL_OK")
</pallas_src>

<mosaic_0001>
module attributes {stable_mosaic.version = 11 : i64} {
  func.func @_softmax_gram_kernel(%arg0: memref<8x32xf32, #tpu.memory_space<vmem>>, %arg1: memref<8x32xf32, #tpu.memory_space<vmem>>, %arg2: memref<8x8xf32, #tpu.memory_space<vmem>>, %arg3: memref<8x8xf32, #tpu.memory_space<vmem>>) attributes {dimension_semantics = [], scalar_prefetch = 0 : i64, scratch_operands = 0 : i64, tpu.core_type = #tpu.core_type<tc>} {
    %c0 = arith.constant 0 : index
    %c0_0 = arith.constant 0 : index
    %0 = vector.load %arg0[%c0, %c0_0] : memref<8x32xf32, #tpu.memory_space<vmem>>, vector<8x32xf32>
    %cst = arith.constant dense<0xFF800000> : vector<8xf32>
    %1 = vector.multi_reduction <maximumf>, %0, %cst [1] : vector<8x32xf32> to vector<8xf32>
    %2 = vector.shape_cast %1 : vector<8xf32> to vector<8x1xf32>
    %3 = vector.broadcast %2 : vector<8x1xf32> to vector<8x32xf32>
    %4 = arith.subf %0, %3 : vector<8x32xf32>
    %5 = math.exp %4 : vector<8x32xf32>
    %cst_1 = arith.constant dense<0.000000e+00> : vector<8xf32>
    %6 = vector.multi_reduction <add>, %5, %cst_1 [1] : vector<8x32xf32> to vector<8xf32>
    %7 = vector.shape_cast %6 : vector<8xf32> to vector<8x1xf32>
    %8 = tpu.reciprocal %7 {approx = true} : vector<8x1xf32> -> vector<8x1xf32>
    %9 = arith.mulf %7, %8 : vector<8x1xf32>
    %cst_2 = arith.constant 2.000000e+00 : f32
    %10 = vector.broadcast %cst_2 : f32 to vector<8x1xf32>
    %11 = arith.subf %10, %9 : vector<8x1xf32>
    %12 = arith.mulf %8, %11 : vector<8x1xf32>
    %13 = vector.broadcast %12 : vector<8x1xf32> to vector<8x32xf32>
    %14 = arith.mulf %5, %13 : vector<8x32xf32>
    %cst_3 = arith.constant dense<0.000000e+00> : vector<8x8xf32>
    %15 = tpu.matmul %14, %14, %cst_3 {dimension_numbers = #tpu.dot_dimension_numbers<[1], [1], [0], [0], [0, 0, 1, 0], [], []>} : vector<8x32xf32>, vector<8x32xf32>, vector<8x8xf32> -> vector<8x8xf32>
    %c0_4 = arith.constant 0 : index
    %c0_5 = arith.constant 0 : index
    %16 = vector.load %arg2[%c0_4, %c0_5] : memref<8x8xf32, #tpu.memory_space<vmem>>, vector<8x8xf32>
    tpu.vector_store %arg2[%c0_4, %c0_5], %15 {strides = array<i32>} : memref<8x8xf32, #tpu.memory_space<vmem>>, vector<8x8xf32>,
    %c0_6 = arith.constant 0 : index
    %c0_7 = arith.constant 0 : index
    %17 = vector.load %arg1[%c0_6, %c0_7] : memref<8x32xf32, #tpu.memory_space<vmem>>, vector<8x32xf32>
    %cst_8 = arith.constant dense<0xFF800000> : vector<8xf32>
    %18 = vector.multi_reduction <maximumf>, %17, %cst_8 [1] : vector<8x32xf32> to vector<8xf32>
    %19 = vector.shape_cast %18 : vector<8xf32> to vector<8x1xf32>
    %20 = vector.broadcast %19 : vector<8x1xf32> to vector<8x32xf32>
    %21 = arith.subf %17, %20 : vector<8x32xf32>
    %22 = math.exp %21 : vector<8x32xf32>
    %cst_9 = arith.constant dense<0.000000e+00> : vector<8xf32>
    %23 = vector.multi_reduction <add>, %22, %cst_9 [1] : vector<8x32xf32> to vector<8xf32>
    %24 = vector.shape_cast %23 : vector<8xf32> to vector<8x1xf32>
    %25 = tpu.reciprocal %24 {approx = true} : vector<8x1xf32> -> vector<8x1xf32>
    %26 = arith.mulf %24, %25 : vector<8x1xf32>
    %cst_10 = arith.constant 2.000000e+00 : f32
    %27 = vector.broadcast %cst_10 : f32 to vector<8x1xf32>
    %28 = arith.subf %27, %26 : vector<8x1xf32>
    %29 = arith.mulf %25, %28 : vector<8x1xf32>
    %30 = vector.broadcast %29 : vector<8x1xf32> to vector<8x32xf32>
    %31 = arith.mulf %22, %30 : vector<8x32xf32>
    %cst_11 = arith.constant dense<0.000000e+00> : vector<8x8xf32>
    %32 = tpu.matmul %31, %31, %cst_11 {dimension_numbers = #tpu.dot_dimension_numbers<[1], [1], [0], [0], [0, 0, 1, 0], [], []>} : vector<8x32xf32>, vector<8x32xf32>, vector<8x8xf32> -> vector<8x8xf32>
    %c0_12 = arith.constant 0 : index
    %c0_13 = arith.constant 0 : index
    %33 = vector.load %arg3[%c0_12, %c0_13] : memref<8x8xf32, #tpu.memory_space<vmem>>, vector<8x8xf32>
    tpu.vector_store %arg3[%c0_12, %c0_13], %32 {strides = array<i32>} : memref<8x8xf32, #tpu.memory_space<vmem>>, vector<8x8xf32>,
    return
  }
}

</mosaic_0001>

<bundles_post_ra>
// kernel: custom-call.4
= control target key start
LH: loop header
LB: loop body
LE: loop exit
PB: predicated region body
PF: predicated region fallthrough
CT: control target
= control target key end

     0   :  { %11 = vsyncpa [#allocation14], 0  ;;  %s1851_s0 = inlined_call_operand.vmem [shape: f32[4,4], index: 0, kind: input, shape index: {}]   ;;  %s1852_s1 = inlined_call_operand.vmem [shape: f32[4,4], index: 1, kind: input, shape index: {}]   ;;  %s1853_s2 = inlined_call_operand.vmem [shape: f32[4,4], index: 2, kind: input, shape index: {}]   ;;  %s1854_s3 = inlined_call_operand.vmem [shape: f32[4,4], index: 3, kind: input, shape index: {}]   ;;  %s1855_s4 = inlined_call_operand.vmem [shape: f32[4], index: 4, kind: output, shape index: {0}]   ;;  %s1856_s5 = inlined_call_operand.vmem [shape: f32[4], index: 5, kind: output, shape index: {1}]   ;;  %s1857_s6 = inlined_call_operand.hbm [shape: f32[4,4], index: 6, kind: output, shape index: {2}]   ;;  %s1858_s7 = inlined_call_operand.hbm [shape: f32[4,4], index: 7, kind: output, shape index: {3}]   ;;  %s1859_s8 = inlined_call_operand.hbm [shape: f32[4,4], index: 8, kind: output, shape index: {4}]   ;;  %s1860_s9 = inlined_call_operand.hbm [shape: f32[4,4], index: 9, kind: output, shape index: {5}]  }
   0x1   :  { %12 = vsyncpa [#allocation17], 0 }
   0x2   :  { %13 = vsyncpa [#allocation22], 0  ;;  %v74_v0 = vld [vmem:[%s1851_s0] sm:$0xf]  ;;  %v295_v2 = vlaneseq  ;;  %v1527_v7 = vmov 0.0   ;;  %s294_s0 = smov [#allocation12] }
   0x3   :  { %v136_v1 = vld [vmem:[%s1852_s1] sm:$0xf]  ;;  %75 = vst [vmem:[#allocation1] sm:$0xf] %v74_v0  ;;  %290 = vst [vmem:[#allocation12] sm:$0xff] %v1527_v7  ;;  %s307_s1 = smov [#allocation20] }
   0x4   :  { %137 = vst [vmem:[#allocation3] sm:$0xf] %v136_v1  ;;  %v198_v3 = vld [vmem:[%s1853_s2] sm:$0xf]  ;;  %v1596_v5 = vand.u32 127, %v295_v2  ;;  %v1598_v6 = vshrl.u32 %v295_v2, 7 }
   0x5   :  { %v260_v4 = vld [vmem:[%s1854_s3] sm:$0xf]  ;;  %199 = vst [vmem:[#allocation5] sm:$0xf] %v198_v3  ;;  %291 = vst [vmem:[#allocation15] sm:$0xff] %v1527_v7  ;;  %s278_s2 = smov [#allocation23] }
   0x6   :  { %261 = vst [vmem:[#allocation7] sm:$0xf] %v260_v4  ;;  %292 = vst [vmem:[#allocation18] sm:$0xff] %v1527_v7  ;;  %v297_v5 = vmov %v1596_v5  ;;  %v300_v6 = vmov %v1598_v6  ;;  %s281_s3 = smov [#allocation24]  ;;  %s284_s17 = smov [#allocation25]  ;;  %vm1223_vm2 = vcmp.lt.s32.totalorder %v1596_v5, 4 }
   0x7   :  { %293 = vst [vmem:[#allocation20] sm:$0xff] %v1527_v7  ;;  %v310_v5 = vmov %v1596_v5  ;;  %v313_v6 = vmov %v1598_v6  ;;  %vm304_vm0 = vcmp.eq.s32.totalorder %v300_v6, %v297_v5  ;;  %s287_s18 = smov [#allocation26]  ;;  %s1219_s19 = smov [#allocation23] }
   0x8   :  { %vm317_vm1 = vcmp.eq.s32.totalorder %v313_v6, %v310_v5  ;;  %s1236_s20 = smov [#allocation24]  ;;  %v1215_v5 = vmov %v1596_v5  ;;  %v1218_v6 = vmov %v1598_v6  ;;  %s1253_s21 = smov [#allocation25] }
   0x9   :  { %s1270_s22 = smov [#allocation26]  ;;  %vm1228_vm3 = vcmp.eq.s32.totalorder %v1218_v6, %v1215_v5  ;;  %v1266_v5 = vmov %v1596_v5  ;;  %v1235_v6 = vmov %v1598_v6 }
   0xa   :  { %v264_v8 = vld [vmem:[#allocation1] sm:$0xf]  ;;  %v301_v12 = vld [vmem:[%s294_s0] sm:$0xf]  ;;  %v1232_v5 = vmov %v1596_v5  ;;  %v1269_v6 = vmov %v1598_v6 }
   0xb   :  { %v268_v9 = vld [vmem:[#allocation3] sm:$0xf]  ;;  %265 = vst [vmem:[#allocation0] sm:$0xf] %v264_v8  ;;  %v305_v14 = vsel %vm304_vm0, 1.0, %v301_v12  ;;  %v1249_v5 = vmov %v1596_v5  ;;  %v1252_v6 = vmov %v1598_v6  ;;  %vm1279_vm4 = vcmp.eq.s32.totalorder %v1269_v6, %v1266_v5 }
   0xc   :  { %269 = vst [vmem:[#allocation2] sm:$0xf] %v268_v9  ;;  %v272_v10 = vld [vmem:[#allocation5] sm:$0xf]  ;;  %306 = vst [vmem:[%s294_s0] sm:$0xf] %v305_v14 }
   0xd   :  { %v276_v11 = vld [vmem:[#allocation7] sm:$0xf]  ;;  %273 = vst [vmem:[#allocation4] sm:$0xf] %v272_v10 }
   0xe   :  { %277 = vst [vmem:[#allocation6] sm:$0xf] %v276_v11  ;;  %v314_v13 = vld [vmem:[%s307_s1] sm:$0xf] }
   0xf   :  { %v318_v15 = vsel %vm317_vm1, 1.0, %v314_v13 }
  0x10   :  { %319 = vst [vmem:[%s307_s1] sm:$0xf] %v318_v15 }
  0x12   :  { %v279_v16 = vld [vmem:[#allocation0] sm:$0xff] }
  0x13   :  { %v282_v17 = vld [vmem:[#allocation2] sm:$0xff]  ;;  %280 = vst [vmem:[%s278_s2] sm:$0xff] %v279_v16 }
  0x14   :  { %283 = vst [vmem:[%s281_s3] sm:$0xff] %v282_v17  ;;  %v285_v18 = vld [vmem:[#allocation4] sm:$0xff] }
  0x15   :  { %v288_v19 = vld [vmem:[#allocation6] sm:$0xff]  ;;  %286 = vst [vmem:[%s284_s17] sm:$0xff] %v285_v18 }
  0x16   :  { %289 = vst [vmem:[%s287_s18] sm:$0xff] %v288_v19 }
  0x1a   :  { %v1225_v20 = vld [vmem:[%s1219_s19] sm:$0xf] }
  0x1b   :  { %v1242_v21 = vld [vmem:[%s1236_s20] sm:$0xf]  ;;  %v1226_v22 = vsel %vm1223_vm2, %v1225_v20, 0.0 }
  0x1c   :  { %v1243_v23 = vsel %vm1223_vm2, %v1242_v21, 0.0  ;;  %v1259_v24 = vld [vmem:[%s1253_s21] sm:$0xf]  ;;  %v1227_v26 = vmul.f32 %v1226_v22, %v1226_v22 }
  0x1d   :  { %v1276_v25 = vld [vmem:[%s1270_s22] sm:$0xf]  ;;  %v1244_v27 = vmul.f32 %v1243_v23, %v1243_v23  ;;  %v1260_v28 = vsel %vm1223_vm2, %v1259_v24, 0.0 }
  0x1e   :  { %v1277_v29 = vsel %vm1223_vm2, %v1276_v25, 0.0  ;;  %v1261_v30 = vmul.f32 %v1260_v28, %v1260_v28  ;;  %v1229_v33 = vsel %vm1228_vm3, 0.0, %v1227_v26 }
  0x1f   :  { %v1246_v31 = vadd.f32 %v1244_v27, %v1227_v26  ;;  %v1278_v32 = vmul.f32 %v1277_v29, %v1277_v29  ;;  %v1245_v34 = vadd.f32 %v1244_v27, %v1229_v33 }
  0x21   :  { %v1263_v35 = vadd.f32 %v1261_v30, %v1246_v31  ;;  %v1262_v36 = vadd.f32 %v1261_v30, %v1245_v34  ;;  %v1280_v37 = vsel %vm1279_vm4, 0.0, %v1278_v32 }
  0x23   :  { %v1282_v38 = vadd.f32 %v1278_v32, %v1263_v35  ;;  %v1281_v39 = vadd.f32 %v1280_v37, %v1262_v36 }
  0x25   :  { %1283 = vadd.xlane.f32.xlu0 %v1282_v38 }
  0x29   :  { %1291 = vadd.xlane.f32.xlu0 %v1281_v39 }
  0xb2   :  { %v1284_v40 = vpop.xlane.xlu0 %1283 }
  0xb3   :  { %v1285_v41 = vrot.slane %v1284_v40, 4 }
  0xb5   :  { %v1286_v42 = vadd.f32 %v1285_v41, %v1284_v40 }
  0xb6   :  { %v1292_v43 = vpop.xlane.xlu0 %1291 }
  0xb7   :  { %v1287_v44 = vrot.slane %v1286_v42, 2  ;;  %v1293_v45 = vrot.slane %v1292_v43, 4 }
  0xb9   :  { %v1294_v46 = vadd.f32 %v1293_v45, %v1292_v43  ;;  %v1288_v47 = vadd.f32 %v1287_v44, %v1286_v42 }
  0xbb   :  { %v1295_v48 = vrot.slane %v1294_v46, 2  ;;  %v1289_v50 = vrot.slane %v1288_v47, 1 }
  0xbd   :  { %v1296_v49 = vadd.f32 %v1295_v48, %v1294_v46  ;;  %v1290_v53 = vadd.f32 %v1289_v50, %v1288_v47 }
  0xbf   :  { %v1297_v51 = vrot.slane %v1296_v49, 1 }
  0xc1   :  { %v1298_v52 = vadd.f32 %v1297_v51, %v1296_v49 }
  0xc3   :  { %1378 = vpush %v1298_v52 }
  0xc4   :  { %1380 = vpush %v1290_v53 }
  0xf4   :  { %s1379_s23 = spop %1378 }
  0xf5   :  { %s1381_s24 = spop %1380 }
  0xf6   :  { %s1301_s25 = smul.f32 1e-10, %s1381_s24 }
  0xf8   :  { %p1302_p0 = scmp.le.f32.partialorder %s1379_s23, %s1301_s25 }
  0xf9   :  { %s1622_s26 = smov (!%p1302_p0), 0  }
  0xfa   :  { %1305 = sbr.rel (%p1302_p0) target bundleno = 932 (0x3a4), region = 324 }
 0x101 LB: > { %s1627_s27 = smov 0   ;;  %s1521_s26 = sphi %s1622_s26, %s1861_s26  }
 0x102 LB: >> { %s424_s28 = smov [#allocation23]  ;;  %v428_v5 = vmov %v1596_v5  ;;  %v431_v6 = vmov %v1598_v6  ;;  %s444_s29 = smov [#allocation24]  ;;  %vm747_vm14 = vcmp.eq.s32.totalorder %v1598_v6, 0  ;;  %vm759_vm15 = vcmp.eq.s32.totalorder %v1598_v6, 3  ;;  %s1525_s27 = sphi %s1627_s27, %s423_s27  }
 0x103   : >> { %v448_v5 = vmov %v1596_v5  ;;  %v451_v6 = vmov %v1598_v6  ;;  %v432_v54 = vld [vmem:[%s424_s28] sm:$0xf]  ;;  %vm435_vm5 = vcmp.eq.s32.totalorder %v431_v6, %v428_v5  ;;  %s464_s30 = smov [#allocation26]  ;;  %s425_s10 = smov [#allocation27] }
 0x104   : >> { %vm455_vm6 = vcmp.eq.s32.totalorder %v451_v6, %v448_v5  ;;  %v468_v5 = vmov %v1596_v5  ;;  %v471_v6 = vmov %v1598_v6  ;;  %v436_v55 = vsel %vm435_vm5, %v432_v54, 0.0  ;;  %v452_v56 = vld [vmem:[%s444_s29] sm:$0xf]  ;;  %s445_s11 = smov [#allocation28]  ;;  %s465_s12 = smov [#allocation29] }
 0x105   : >> { %vm475_vm7 = vcmp.eq.s32.totalorder %v471_v6, %v468_v5  ;;  %v437_v57 = vrot.slane %v436_v55, 4  ;;  %v456_v58 = vsel %vm455_vm6, %v452_v56, 0.0  ;;  %v472_v59 = vld [vmem:[%s464_s30] sm:$0xf]  ;;  %s488_s13 = smov [#allocation28]  ;;  %s486_s14 = smov [#allocation27]  ;;  %v537_v5 = vmov %v1596_v5 }
 0x106   : >> { %v457_v60 = vrot.slane %v456_v58, 4  ;;  %v476_v61 = vsel %vm475_vm7, %v472_v59, 0.0  ;;  %s490_s15 = smov [#allocation29]  ;;  %s525_s16 = smov [#allocation30]  ;;  %v540_v6 = vmov %v1598_v6  ;;  %v552_v5 = vmov %v1596_v5 }
 0x107   : >> { %v438_v62 = vadd.f32 %v437_v57, %v436_v55  ;;  %v477_v63 = vrot.slane %v476_v61, 4  ;;  %s527_s0 = smov [#allocation31]  ;;  %s484_s1 = smov [#allocation32]  ;;  %v555_v6 = vmov %v1598_v6  ;;  %vm542_vm12 = vcmp.eq.s32.totalorder %v540_v6, %v537_v5 }
 0x108   : >> { %v458_v0 = vadd.f32 %v457_v60, %v456_v58  ;;  %s485_s2 = smov [#allocation33]  ;;  %s529_s1 = smov %s484_s1  ;;  %vm557_vm13 = vcmp.eq.s32.totalorder %v555_v6, %v552_v5  ;;  %v650_v5 = vmov %v1596_v5  ;;  %v653_v6 = vmov %v1598_v6 }
 0x109   : >> { %v439_v1 = vrot.slane %v438_v62, 2  ;;  %v478_v2 = vadd.f32 %v477_v63, %v476_v61  ;;  %s531_s2 = smov %s485_s2  ;;  %s533_s3 = smov [#allocation32]  ;;  %v664_v5 = vmov %v1596_v5  ;;  %v667_v6 = vmov %v1598_v6 }
 0x10a   : >> { %v459_v3 = vrot.slane %v458_v0, 2  ;;  %s548_s17 = smov [#allocation33]  ;;  %s546_s18 = smov [#allocation34]  ;;  %vm657_vm0 = vcmp.eq.s32.totalorder %v653_v6, %v650_v5  ;;  %v623_v5 = vmov %v1596_v5  ;;  %v626_v6 = vmov %v1598_v6 }
 0x10b   : >> { %v440_v4 = vadd.f32 %v439_v1, %v438_v62  ;;  %v479_v7 = vrot.slane %v478_v2, 2  ;;  %s563_s19 = smov [#allocation34]  ;;  %s1642_s20 = smov [#allocation23]  ;;  %v637_v5 = vmov %v1596_v5  ;;  %v640_v6 = vmov %v1598_v6 }
 0x10c   : >> { %v460_v8 = vadd.f32 %v459_v3, %v458_v0  ;;  %s561_s21 = smov [#allocation35]  ;;  %s1644_s22 = smov [#allocation24]  ;;  %v571_v53 = vld [vmem:[%s1642_s20] sm:$0xf]  ;;  %vm672_vm1 = vcmp.eq.s32.totalorder %v667_v6, %v664_v5  ;;  %vm631_vm3 = vcmp.eq.s32.totalorder %v626_v6, %v623_v5  ;;  %vm644_vm4 = vcmp.eq.s32.totalorder %v640_v6, %v637_v5 }
 0x10d   : >> { %v441_v9 = vrot.slane %v440_v4, 1  ;;  %v480_v10 = vadd.f32 %v479_v7, %v478_v2  ;;  %s1646_s23 = smov [#allocation25]  ;;  %s1648_s24 = smov [#allocation26]  ;;  %v572_v54 = vld [vmem:[%s1644_s22] sm:$0xf]  ;;  %vm686_vm5 = vcmp.eq.s32.totalorder %v1596_v5, 0 }
 0x10e   : >> { %v461_v11 = vrot.slane %v460_v8, 1  ;;  %s1650_s25 = smov [#allocation12]  ;;  %s1652_s28 = smov [#allocation15]  ;;  %v573_v55 = vld [vmem:[%s1646_s23] sm:$0xf]  ;;  %vm690_vm6 = vcmp.eq.s32.totalorder %v1596_v5, 1 }
 0x10f   : >> { %v442_v12 = vadd.f32 %v441_v9, %v440_v4  ;;  %v481_v13 = vrot.slane %v480_v10, 1  ;;  %s1654_s29 = smov [#allocation18]  ;;  %s787_s30 = smov [#allocation34]  ;;  %v574_v56 = vld [vmem:[%s1648_s24] sm:$0xf]  ;;  %vm703_vm7 = vcmp.eq.s32.totalorder %v1596_v5, 3 }
 0x110   : >> { %v462_v14 = vadd.f32 %v461_v11, %v460_v8  ;;  %v795_v57 = vld [vmem:[%s1650_s25] sm:$0xf]  ;;  %s423_s27 = sadd.s32 1, %s1525_s27  }
 0x111   : >> { %443 = vst [vmem:[%s425_s10] sm:$0x1] %v442_v12  ;;  %v482_v15 = vadd.f32 %v481_v13, %v480_v10  ;;  %s1658_s10 = smov [#allocation20]  ;;  %v796_v58 = vld [vmem:[%s1652_s28] sm:$0xf]  ;;  %p420_p1 = scmp.ge.s32.totalorder %s423_s27, 7  }
 0x112   : >> { %463 = vst [vmem:[%s445_s11] sm:$0x1] %v462_v14  ;;  %v797_v59 = vld [vmem:[%s1654_s29] sm:$0xf]  ;;  %s565_s11 = smov [#allocation35]  ;;  %v324_v5 = vmov (%p420_p1), %v1596_v5  ;;  %v327_v6 = vmov (%p420_p1), %v1598_v6 }
 0x113   : >> { %483 = vst [vmem:[%s465_s12] sm:$0x1] %v482_v15  ;;  %v798_v61 = vld [vmem:[%s1658_s10] sm:$0xf]  ;;  %s789_s12 = smov [#allocation35]  ;;  %v377_v5 = vmov (%p420_p1), %v1596_v5 }
 0x118   : >> { %v487_v18 = vld [vmem:[%s486_s14] sm:$0xff]  ;;  %s593_s14 = smov [#allocation33] }
 0x119   : >> { %v489_v16 = vld [vmem:[%s488_s13] sm:$0xff]  ;;  %v510_v31 = vand.u32 2147483647, %v487_v18  ;;  %s591_s13 = smov [#allocation32] }
 0x11a   : >> { %v493_v17 = vmul.f32 2.0, %v489_v16  ;;  %v491_v19 = vld [vmem:[%s490_s15] sm:$0xff]  ;;  %v511_v36 = vand.u32 2147483647, %v489_v16  ;;  %s1674_s15 = smov [#allocation12] }
 0x11b   : >> { %v492_v20 = vsub.f32 %v491_v19, %v487_v18  ;;  %v512_v32 = vand.u32 2147483647, %v491_v19 }
 0x11c   : >> { %1409 = vrcp.f32 %v493_v17 }
 0x11d   : >> { %v513_v35 = vmin.f32 %v510_v31, %v512_v32 }
 0x11f   : >> { %v514_v37 = vmul.f32 1.1920929e-08, %v513_v35 }
 0x121   : >> { %vm515_vm11 = vcmp.le.f32.partialorder %v511_v36, %v514_v37 }
 0x126   : >> { %v1410_v21 = vpop.eup %1409 }
 0x127   : >> { %v495_v22 = vmul.f32 %v1410_v21, %v492_v20 }
 0x129   : >> { %v497_v23 = vmul.f32 %v495_v22, %v495_v22  ;;  %vm496_vm10 = vcmp.ge.f32.partialorder %v495_v22, 0.0 }
 0x12b   : >> { %v498_v24 = vadd.f32 1.0, %v497_v23 }
 0x12d   : >> { %1411 = vrsqrt.f32 %v498_v24  ;;  %vm501_vm8 = vcmp.eq.f32.partialorder %v498_v24, inf  ;;  %v504_v26 = vand.u32 2147483648, %v498_v24  ;;  %vm503_vm9 = vcmp.eq.f32.partialorder %v498_v24, 0.0 }
 0x137   : >> { %v1412_v25 = vpop.eup %1411 }
 0x138   : >> { %v500_v27 = vmul.f32 %v1412_v25, %v498_v24 }
 0x13a   : >> { %v502_v28 = vsel %vm501_vm8, %v498_v24, %v500_v27  ;;  %vm339_vm8 = vcmp.eq.s32.totalorder (%p420_p1), %v327_v6, %v324_v5  ;;  %v380_v6 = vmov (%p420_p1), %v1598_v6  ;;  %v343_v5 = vmov (%p420_p1), %v1596_v5 }
 0x13b   : >> { %v505_v29 = vsel %vm503_vm9, %v504_v26, %v502_v28  ;;  %v346_v6 = vmov (%p420_p1), %v1598_v6  ;;  %v360_v5 = vmov (%p420_p1), %v1596_v5  ;;  %vm392_vm9 = vcmp.eq.s32.totalorder (%p420_p1), %v380_v6, %v377_v5 }
 0x13c   : >> { %v506_v30 = vxor.u32 2147483648, %v505_v29  ;;  %v363_v6 = vmov (%p420_p1), %v1598_v6 }
 0x13e   : >> { %v507_v33 = vsel %vm496_vm10, %v505_v29, %v506_v30 }
 0x13f   : >> { %v508_v34 = vadd.f32 %v507_v33, %v495_v22 }
 0x141   : >> { %1413 = vrcp.f32 %v508_v34 }
 0x14b   : >> { %v1414_v38 = vpop.eup %1413 }
 0x14c   : >> { %v516_v39 = vsel %vm515_vm11, 0.0, %v1414_v38 }
 0x14d   : >> { %v517_v40 = vmul.f32 %v516_v39, %v516_v39  ;;  %v521_v41 = vmul.f32 %v516_v39, %v489_v16 }
 0x14f   : >> { %v518_v42 = vadd.f32 1.0, %v517_v40  ;;  %v522_v43 = vsub.f32 %v487_v18, %v521_v41  ;;  %v524_v44 = vadd.f32 %v521_v41, %v491_v19 }
 0x151   : >> { %1415 = vrsqrt.f32 %v518_v42  ;;  %526 = vst [vmem:[%s525_s16] sm:$0xff] %v522_v43  ;;  %528 = vst [vmem:[%s527_s0] sm:$0xff] %v524_v44  ;;  %s1676_s16 = smov [#allocation25]  ;;  %s1678_s0 = smov [#allocation26] }
 0x15b   : >> { %v1416_v45 = vpop.eup %1415 }
 0x15c   : >> { %530 = vst [vmem:[%s529_s1] sm:$0xff] %v1416_v45  ;;  %v520_v46 = vmul.f32 %v1416_v45, %v516_v39  ;;  %s1680_s1 = smov [#allocation23] }
 0x15e   : >> { %532 = vst [vmem:[%s531_s2] sm:$0xff] %v520_v46  ;;  %s1682_s2 = smov [#allocation18] }
 0x163   : >> { %v534_v47 = vld [vmem:[%s533_s3] ss:$0 sm:$0xff]  ;;  %s1684_s3 = smov [#allocation15] }
 0x164   : >> { %v543_v48 = vsel %vm542_vm12, %v534_v47, 0.0  ;;  %v592_v27 = vld [vmem:[%s591_s13] ss:$0 sm:$0xff]  ;;  %s763_s13 = smov [#allocation24] }
 0x165   : >> { %544 = vadd.xlane.f32.xlu0 %v543_v48  ;;  %v549_v49 = vld [vmem:[%s548_s17] ss:$0 sm:$0xff]  ;;  %s1688_s17 = smov [#allocation20] }
 0x166   : >> { %v558_v50 = vsel %vm557_vm13, %v549_v49, 0.0  ;;  %v594_v28 = vld [vmem:[%s593_s14] ss:$0 sm:$0xff]  ;;  %s740_s14 = smov [#allocation25] }
 0x169   : >> { %559 = vadd.xlane.f32.xlu0 %v558_v50 }
 0x1f2   : >> { %v545_v51 = vpop.xlane.xlu0 %544 }
 0x1f3   : >> { %547 = vst [vmem:[%s546_s18] sm:$0xff] %v545_v51  ;;  %s1690_s18 = smov [#allocation24] }
 0x1f6   : >> { %v560_v52 = vpop.xlane.xlu0 %559 }
 0x1f7   : >> { %562 = vst [vmem:[%s561_s21] sm:$0xff] %v560_v52  ;;  %s660_s21 = smov [#allocation26] }
 0x1fa   : >> { %v564_v60 = vld [vmem:[%s563_s19] sm:$0xff]  ;;  %s661_s19 = smov [#allocation31] }
 0x1fb   : >> { %v788_v62 = vld [vmem:[%s787_s30] sm:$0xff]  ;;  %v575_v63 = vmul.f32 %v571_v53, %v564_v60  ;;  %v578_v0 = vmul.f32 %v572_v54, %v564_v60  ;;  %v582_v1 = vmul.f32 %v573_v55, %v564_v60  ;;  %v585_v2 = vmul.f32 %v574_v56, %v564_v60  ;;  %s676_s30 = smov [#allocation24] }
 0x1fc   : >> { %v799_v3 = vmul.f32 %v795_v57, %v788_v62  ;;  %v802_v4 = vmul.f32 %v796_v58, %v788_v62  ;;  %v806_v7 = vmul.f32 %v797_v59, %v788_v62  ;;  %v809_v8 = vmul.f32 %v798_v61, %v788_v62 }
 0x1fe   : >> { %v566_v9 = vld [vmem:[%s565_s11] sm:$0xff]  ;;  %s1735_s11 = smov [#allocation26] }
 0x1ff   : >> { %v790_v10 = vld [vmem:[%s789_s12] sm:$0xff]  ;;  %v576_v11 = vmul.f32 %v573_v55, %v566_v9  ;;  %v579_v12 = vmul.f32 %v574_v56, %v566_v9  ;;  %v581_v13 = vmul.f32 %v571_v53, %v566_v9  ;;  %v584_v14 = vmul.f32 %v572_v54, %v566_v9  ;;  %s739_s12 = smov [#allocation23] }
 0x200   : >> { %v800_v15 = vmul.f32 %v797_v59, %v790_v10  ;;  %v803_v16 = vmul.f32 %v798_v61, %v790_v10  ;;  %v805_v17 = vmul.f32 %v795_v57, %v790_v10  ;;  %v808_v18 = vmul.f32 %v796_v58, %v790_v10  ;;  %v668_v59 = vld [vmem:[%s661_s19] ss:$0 sm:$0xff] }
 0x201   : >> { %v577_v19 = vsub.f32 %v575_v63, %v576_v11  ;;  %v580_v20 = vsub.f32 %v578_v0, %v579_v12  ;;  %v583_v21 = vadd.f32 %v582_v1, %v581_v13  ;;  %v586_v22 = vadd.f32 %v585_v2, %v584_v14 }
 0x202   : >> { %v801_v23 = vsub.f32 %v799_v3, %v800_v15  ;;  %v804_v24 = vsub.f32 %v802_v4, %v803_v16  ;;  %v807_v25 = vadd.f32 %v806_v7, %v805_v17  ;;  %v810_v26 = vadd.f32 %v809_v8, %v808_v18 }
 0x203   : >> { %588 = vst [vmem:[%s1644_s22] sm:$0xf] %v580_v20  ;;  %590 = vst [vmem:[%s1648_s24] sm:$0xf] %v586_v22  ;;  %s620_s22 = smov [#allocation30]  ;;  %s634_s24 = smov [#allocation24] }
 0x204   : >> { %587 = vst [vmem:[%s1642_s20] sm:$0xf] %v577_v19  ;;  %589 = vst [vmem:[%s1646_s23] sm:$0xf] %v583_v21  ;;  %s647_s20 = smov [#allocation25]  ;;  %s619_s23 = smov [#allocation23]  ;;  %v627_v63 = vld [vmem:[%s620_s22] ss:$0 sm:$0xff] }
 0x205   : >> { %811 = vst [vmem:[%s1650_s25] sm:$0xf] %v801_v23  ;;  %812 = vst [vmem:[%s1652_s28] sm:$0xf] %v804_v24  ;;  %s1732_s25 = smov [#allocation25]  ;;  %s1528_s28 = smov 1  }
 0x206   : >> { %813 = vst [vmem:[%s1654_s29] sm:$0xf] %v807_v25  ;;  %814 = vst [vmem:[%s1658_s10] sm:$0xf] %v810_v26  ;;  %s675_s29 = smov [#allocation23]  ;;  %s1529_s10 = smov 127  }
 0x20a   : >> { %v602_v30 = vld [vmem:[%s1678_s0] sm:$0xf] }
 0x20b   : >> { %v601_v29 = vld [vmem:[%s1676_s16] sm:$0xf]  ;;  %v610_v36 = vmul.f32 %v602_v30, %v594_v28  ;;  %v613_v42 = vmul.f32 %v602_v30, %v592_v27 }
 0x20c   : >> { %v599_v31 = vld [vmem:[%s1680_s1] sm:$0xf]  ;;  %v609_v35 = vmul.f32 %v601_v29, %v592_v27  ;;  %v612_v37 = vmul.f32 %v601_v29, %v594_v28 }
 0x20d   : >> { %v817_v32 = vld [vmem:[%s1674_s15] ss:$0 sm:$0xff]  ;;  %v1365_v34 = vld [vmem:[%s1674_s15 + $0x3] ss:$0 sm:$0xff]  ;;  %v603_v48 = vmul.f32 %v599_v31, %v592_v27  ;;  %v606_v49 = vmul.f32 %v599_v31, %v594_v28 }
 0x20e   : >> { %v1364_v33 = vld [vmem:[%s1674_s15 - $0x1] sm:$0xe]  ;;  %v1369_v45 = vld [vmem:[%s1684_s3 + $0x3] ss:$0 sm:$0xff]  ;;  %v611_v47 = vsub.f32 %v609_v35, %v610_v36  ;;  %v614_v53 = vadd.f32 %v613_v42, %v612_v37 }
 0x20f   : >> { %v824_v38 = vsel %vm747_vm14, %v817_v32, %v1364_v33  ;;  %v828_v39 = vld [vmem:[%s1682_s2] ss:$0 sm:$0xff]  ;;  %v1367_v40 = vld [vmem:[%s1682_s2 + $0x1] sm:$0x7] }
 0x210   : >> { %v841_v41 = vld [vmem:[%s1684_s3] ss:$0 sm:$0xff]  ;;  %827 = vst [vmem:[%s1674_s15] sm:$0xf] %v824_v38  ;;  %v836_v43 = vsel %vm759_vm15, %v1365_v34, %v1367_v40  ;;  %v1371_v51 = vld [vmem:[%s1688_s17 + $0x1] sm:$0x7]  ;;  %617 = vst [vmem:[%s1676_s16] sm:$0xf] %v611_v47 }
 0x211   : >> { %v1368_v44 = vld [vmem:[%s1684_s3 - $0x1] sm:$0xe]  ;;  %1366 = vst [vmem:[%s1674_s15 + $0x1] sm:$0x1] %v828_v39  ;;  %838 = vst [vmem:[%s1682_s2] sm:$0xf] %v836_v43  ;;  %v860_v54 = vsel %vm759_vm15, %v1369_v45, %v1371_v51  ;;  %s764_s15 = smov [#allocation26] }
 0x212   : >> { %v852_v46 = vld [vmem:[%s1688_s17] ss:$0 sm:$0xff]  ;;  %v848_v50 = vsel %vm747_vm14, %v841_v41, %v1368_v44  ;;  %618 = vst [vmem:[%s1678_s0] sm:$0xf] %v614_v53  ;;  %s863_s16 = sadd.s32 (%p420_p1), 1, %s1521_s26   ;;  %s328_s0 = smov (%p420_p1), [#allocation23] }
 0x213   : >> { %v600_v52 = vld [vmem:[%s1690_s18] sm:$0xf]  ;;  %851 = vst [vmem:[%s1684_s3] sm:$0xf] %v848_v50  ;;  %862 = vst [vmem:[%s1688_s17] sm:$0xf] %v860_v54  ;;  %s364_s2 = smov (%p420_p1), [#allocation25]  ;;  %p416_p2 = scmp.ge.s32.totalorder (%p420_p1), %s863_s16, 15 }
 0x214   : >> { %v604_v55 = vmul.f32 %v600_v52, %v594_v28  ;;  %v607_v56 = vmul.f32 %v600_v52, %v592_v27  ;;  %1370 = vst [vmem:[%s1684_s3 + $0x1] sm:$0x1] %v852_v46  ;;  %s381_s3 = smov (%p420_p1), [#allocation26]  ;;  %s1861_s26 = smov (%p420_p1), %s863_s16 }
 0x216   : >> { %v605_v57 = vsub.f32 %v603_v48, %v604_v55  ;;  %v608_v58 = vadd.f32 %v607_v56, %v606_v49 }
 0x217   : >> { %v654_v60 = vld [vmem:[%s647_s20] sm:$0xf] }
 0x218   : >> { %615 = vst [vmem:[%s1680_s1] sm:$0xf] %v605_v57  ;;  %616 = vst [vmem:[%s1690_s18] sm:$0xf] %v608_v58  ;;  %v658_v61 = vsel %vm657_vm0, 0.0, %v654_v60  ;;  %s347_s1 = smov (%p420_p1), [#allocation24] }
 0x219   : >> { %v669_v62 = vld [vmem:[%s660_s21] sm:$0xf]  ;;  %659 = vst [vmem:[%s647_s20] sm:$0xf] %v658_v61 }
 0x21a   : >> { %v673_v0 = vsel %vm672_vm1, %v668_v59, %v669_v62 }
 0x21b   : >> { %674 = vst [vmem:[%s660_s21] sm:$0xf] %v673_v0 }
 0x21f   : >> { %v628_v1 = vld [vmem:[%s619_s23] sm:$0xf] }
 0x220   : >> { %v641_v2 = vld [vmem:[%s634_s24] sm:$0xf]  ;;  %v632_v3 = vsel %vm631_vm3, %v627_v63, %v628_v1 }
 0x221   : >> { %v645_v4 = vsel %vm644_vm4, 0.0, %v641_v2  ;;  %633 = vst [vmem:[%s619_s23] sm:$0xf] %v632_v3  ;;  %v713_v7 = vld [vmem:[%s1732_s25] sm:$0xf] }
 0x222   : >> { %646 = vst [vmem:[%s634_s24] sm:$0xf] %v645_v4  ;;  %714 = vrot.lane.b32.xlu0 %v713_v7, %s1528_s28  ;;  %v709_v11 = vld [vmem:[%s1735_s11] sm:$0xf] }
 0x223   : >> { %v730_v12 = vld [vmem:[%s1735_s11] sm:$0xf] }
 0x224   : >> { %v712_v30 = vld [vmem:[%s1732_s25] sm:$0xf] }
 0x228   : >> { %v681_v8 = vld [vmem:[%s675_s29] sm:$0xf] }
 0x229   : >> { %682 = vrot.lane.b32.xlu1 %v681_v8, %s1528_s28  ;;  %v677_v9 = vld [vmem:[%s676_s30] sm:$0xf] }
 0x22a   : >> { %v698_v10 = vld [vmem:[%s676_s30] sm:$0xf] }
 0x22b   : >> { %v680_v18 = vld [vmem:[%s675_s29] sm:$0xf] }
 0x22d   : >> { %678 = vrot.lane.b32.xlu1 %v677_v9, %s1528_s28 }
 0x231   : >> { %699 = vrot.lane.b32.xlu1 %v698_v10, %s1529_s10 }
 0x235   : >> { %710 = vrot.lane.b32.xlu1 %v709_v11, %s1528_s28 }
 0x239   : >> { %731 = vrot.lane.b32.xlu1 %v730_v12, %s1529_s10 }
 0x294   : >> { %v715_v20 = vpop.permute.xlu0 %714 }
 0x295   : >> { %v719_v22 = vsel %vm686_vm5, %v713_v7, %v715_v20 }
 0x29b   : >> { %v683_v13 = vpop.permute.xlu1 %682 }
 0x29c   : >> { %v687_v14 = vsel %vm686_vm5, %v681_v8, %v683_v13 }
 0x29f   : >> { %v679_v15 = vpop.permute.xlu1 %678 }
 0x2a0   : >> { %v691_v16 = vsel %vm690_vm6, %v679_v15, %v687_v14 }
 0x2a1   : >> { %v697_v17 = vsel %vm1223_vm2, %v691_v16, 0.0 }
 0x2a2   : >> { %705 = vst [vmem:[%s675_s29] sm:$0xf] %v697_v17 }
 0x2a3   : >> { %v700_v19 = vpop.permute.xlu1 %699 }
 0x2a4   : >> { %v704_v21 = vsel %vm703_vm7, %v680_v18, %v700_v19 }
 0x2a5   : >> { %706 = vst [vmem:[%s676_s30] sm:$0xf] %v704_v21 }
 0x2a7   : >> { %v711_v23 = vpop.permute.xlu1 %710 }
 0x2a8   : >> { %v723_v24 = vsel %vm690_vm6, %v711_v23, %v719_v22 }
 0x2a9   : >> { %v741_v25 = vld [vmem:[%s739_s12] ss:$0 sm:$0xff]  ;;  %v1357_v27 = vld [vmem:[%s739_s12 + $0x3] ss:$0 sm:$0xff]  ;;  %v729_v29 = vsel %vm1223_vm2, %v723_v24, 0.0 }
 0x2aa   : >> { %v1356_v26 = vld [vmem:[%s739_s12 - $0x1] sm:$0xe]  ;;  %737 = vst [vmem:[%s1732_s25] sm:$0xf] %v729_v29 }
 0x2ab   : >> { %v748_v28 = vsel %vm747_vm14, %v741_v25, %v1356_v26  ;;  %v732_v31 = vpop.permute.xlu1 %731 }
 0x2ac   : >> { %751 = vst [vmem:[%s739_s12] sm:$0xf] %v748_v28  ;;  %v765_v32 = vld [vmem:[%s763_s13] ss:$0 sm:$0xff]  ;;  %v1361_v34 = vld [vmem:[%s763_s13 + $0x3] ss:$0 sm:$0xff]  ;;  %v736_v35 = vsel %vm703_vm7, %v712_v30, %v732_v31 }
 0x2ad   : >> { %v1360_v33 = vld [vmem:[%s763_s13 - $0x1] sm:$0xe]  ;;  %738 = vst [vmem:[%s1735_s11] sm:$0xf] %v736_v35 }
 0x2ae   : >> { %v772_v36 = vsel %vm747_vm14, %v765_v32, %v1360_v33 }
 0x2af   : >> { %775 = vst [vmem:[%s763_s13] sm:$0xf] %v772_v36 }
 0x2b1   : >> { %v752_v37 = vld [vmem:[%s740_s14] ss:$0 sm:$0xff]  ;;  %v1359_v38 = vld [vmem:[%s740_s14 + $0x1] sm:$0x7] }
 0x2b2   : >> { %1358 = vst [vmem:[%s739_s12 + $0x1] sm:$0x1] %v752_v37  ;;  %v760_v39 = vsel %vm759_vm15, %v1357_v27, %v1359_v38  ;;  %422 = sbr.rel (!%p420_p1) target bundleno = 258 (0x102), region = 319 }
 0x2b3   : >> { %762 = vst [vmem:[%s740_s14] sm:$0xf] %v760_v39 }
 0x2b4   : >> { %v776_v40 = vld [vmem:[%s764_s15] ss:$0 sm:$0xff]  ;;  %v1363_v41 = vld [vmem:[%s764_s15 + $0x1] sm:$0x7] }
 0x2b5   : >> { %1362 = vst [vmem:[%s763_s13 + $0x1] sm:$0x1] %v776_v40  ;;  %v784_v42 = vsel %vm759_vm15, %v1361_v34, %v1363_v41 }
 0x2b6   : >> { %786 = vst [vmem:[%s764_s15] sm:$0xf] %v784_v42 }
 0x2b9   : > { %v334_v43 = vld [vmem:[%s328_s0] sm:$0xf] }
 0x2ba   : > { %v335_v45 = vsel %vm1223_vm2, %v334_v43, 0.0  ;;  %v370_v47 = vld [vmem:[%s364_s2] sm:$0xf] }
 0x2bb   : > { %v336_v49 = vmul.f32 %v335_v45, %v335_v45  ;;  %v371_v51 = vsel %vm1223_vm2, %v370_v47, 0.0 }
 0x2bc   : > { %v353_v44 = vld [vmem:[%s347_s1] sm:$0xf]  ;;  %v372_v53 = vmul.f32 %v371_v51, %v371_v51 }
 0x2bd   : > { %v354_v46 = vsel %vm1223_vm2, %v353_v44, 0.0  ;;  %v387_v48 = vld [vmem:[%s381_s3] sm:$0xf]  ;;  %v340_v56 = vsel %vm339_vm8, 0.0, %v336_v49 }
 0x2be   : > { %v355_v50 = vmul.f32 %v354_v46, %v354_v46  ;;  %v388_v52 = vsel %vm1223_vm2, %v387_v48, 0.0 }
 0x2bf   : > { %v389_v55 = vmul.f32 %v388_v52, %v388_v52 }
 0x2c0   : > { %v357_v54 = vadd.f32 %v355_v50, %v336_v49  ;;  %v356_v57 = vadd.f32 %v355_v50, %v340_v56 }
 0x2c1   : > { %v393_v60 = vsel %vm392_vm9, 0.0, %v389_v55 }
 0x2c2   : > { %v374_v58 = vadd.f32 %v372_v53, %v357_v54  ;;  %v373_v59 = vadd.f32 %v372_v53, %v356_v57 }
 0x2c4   : > { %v395_v61 = vadd.f32 %v389_v55, %v374_v58  ;;  %v394_v62 = vadd.f32 %v393_v60, %v373_v59 }
 0x2c6   : > { %396 = vadd.xlane.f32.xlu0 %v395_v61 }
 0x2ca   : > { %404 = vadd.xlane.f32.xlu0 %v394_v62 }
 0x353   : > { %v397_v63 = vpop.xlane.xlu0 %396 }
 0x354   : > { %v398_v0 = vrot.slane %v397_v63, 4 }
 0x356   : > { %v399_v1 = vadd.f32 %v398_v0, %v397_v63 }
 0x357   : > { %v405_v2 = vpop.xlane.xlu0 %404 }
 0x358   : > { %v400_v3 = vrot.slane %v399_v1, 2  ;;  %v406_v4 = vrot.slane %v405_v2, 4 }
 0x35a   : > { %v407_v7 = vadd.f32 %v406_v4, %v405_v2  ;;  %v401_v8 = vadd.f32 %v400_v3, %v399_v1 }
 0x35c   : > { %v408_v9 = vrot.slane %v407_v7, 2  ;;  %v402_v11 = vrot.slane %v401_v8, 1 }
 0x35e   : > { %v409_v10 = vadd.f32 %v408_v9, %v407_v7  ;;  %v403_v14 = vadd.f32 %v402_v11, %v401_v8 }
 0x360   : > { %v410_v12 = vrot.slane %v409_v10, 1 }
 0x362   : > { %v411_v13 = vadd.f32 %v410_v12, %v409_v10 }
 0x364   : > { %1382 = vpush %v411_v13 }
 0x365   : > { %1384 = vpush %v403_v14 }
 0x395   : > { %s1383_s27 = spop %1382 }
 0x396   : > { %s1385_s17 = spop %1384 }
 0x397   : > { %s414_s18 = smul.f32 1e-10, %s1385_s17 }
 0x399   : > { %p415_p3 = scmp.le.f32.partialorder %s1383_s27, %s414_s18 }
 0x39b   : > { %p417_p4 = por %p416_p2, %p415_p3 }
 0x39d   :  { %865 = sbr.rel (!%p417_p4) target bundleno = 257 (0x101), region = 330 }
 0x3a4 PF:  { %v927_v15 = vld [vmem:[#allocation15] sm:$0xf]  ;;  %s866_s19 = smov [#allocation23]  ;;  %v870_v5 = vmov %v1596_v5  ;;  %v873_v6 = vmov %v1598_v6  ;;  %v921_v16 = vld [vmem:[#allocation12] sm:$0xf]  ;;  %s1530_s20 = smov [#allocation16]  }
 0x3a5   :  { %v890_v5 = vmov %v1596_v5  ;;  %v893_v6 = vmov %v1598_v6  ;;  %929 = vst [vmem:[#allocation16] sm:$0xf] %v927_v15  ;;  %s1080_s21 = sshll.u32 %s1530_s20, 4  ;;  %v874_v17 = vld [vmem:[%s866_s19] sm:$0xf]  ;;  %vm877_vm10 = vcmp.eq.s32.totalorder %v873_v6, %v870_v5  ;;  %s886_s26 = smov [#allocation26]  ;;  %s1081_s21 = int_to_ptr.vmem [resolvable:$true] %s1080_s21 }
 0x3a6   :  { %vm897_vm11 = vcmp.eq.s32.totalorder %v893_v6, %v890_v5  ;;  %923 = vst [vmem:[#allocation13] sm:$0xf] %v921_v16  ;;  %v933_v18 = vld [vmem:[#allocation18] sm:$0xf]  ;;  %v878_v19 = vsel %vm877_vm10, %v874_v17, 0.0  ;;  %s1417_s22 = scalar_lea.vmem %s1081_s21, 64  ;;  %p1422_p6 = scmp.lt.s32.totalorder %s1081_s21, %s1081_s21 }
 0x3a7   :  { %935 = vst [vmem:[#allocation19] sm:$0xf] %v933_v18  ;;  %v939_v20 = vld [vmem:[#allocation20] sm:$0xf]  ;;  %p1418_p5 = scmp.ne.s32.totalorder %s1081_s21, %s1417_s22  ;;  %p1423_p7 = scmp.lt.s32.totalorder %s1417_s22, %s1417_s22 }
 0x3a9   :  { %p1424_p8 = por %p1423_p7, %p1422_p6 }
 0x3ab   :  { %p1425_p9 = pnand %p1424_p8, %p1418_p5 }
 0x3ad   :  { %1428 = shalt.err (!%p1425_p9)
}
 0x3ae   :  { %s1429_s25 = scalar_lea.hbm %s1858_s7, 64 }
 0x3af   :  { %p1430_p10 = scmp.ne.s32.totalorder %s1858_s7, %s1429_s25  ;;  %p1433_p11 = scmp.lt.u32.totalorder %s1429_s25, %s1858_s7 }
 0x3b1   :  { %p1435_p12 = pnand %p1433_p11, %p1430_p10 }
 0x3b3   :  { %1438 = shalt.err (!%p1435_p12)
}
 0x3b4   :  { %1083 = dma.vmem_to_hbm [thread:$0]  %s1081_s21, 64, %s1858_s7, [#allocation17]   ;;  %v879_v21 = vrot.slane %v878_v19, 4  ;;  %v894_v22 = vld [vmem:[%s886_s26] sm:$0xf] }
 0x3b5   :  { %941 = vst [vmem:[#allocation21] sm:$0xf] %v939_v20  ;;  %v898_v23 = vsel %vm897_vm11, %v894_v22, 0.0  ;;  %s1531_s13 = smov [#allocation13]   ;;  %s1532_s15 = smov [#allocation19]  }
 0x3b6   :  { %v880_v24 = vadd.f32 %v879_v21, %v878_v19  ;;  %v899_v25 = vrot.slane %v898_v23, 4  ;;  %s1073_s14 = sshll.u32 %s1531_s13, 4  ;;  %s1087_s16 = sshll.u32 %s1532_s15, 4  ;;  %s1074_s14 = int_to_ptr.vmem [resolvable:$true] %s1073_s14  ;;  %s1088_s16 = int_to_ptr.vmem [resolvable:$true] %s1087_s16 }
 0x3b7   :  { %s1439_s0 = scalar_lea.vmem %s1074_s14, 64  ;;  %p1444_p0 = scmp.lt.s32.totalorder %s1074_s14, %s1074_s14 }
 0x3b8   :  { %v881_v26 = vrot.slane %v880_v24, 2  ;;  %v900_v27 = vadd.f32 %v899_v25, %v898_v23  ;;  %p1440_p13 = scmp.ne.s32.totalorder %s1074_s14, %s1439_s0  ;;  %p1445_p1 = scmp.lt.s32.totalorder %s1439_s0, %s1439_s0 }
 0x3ba   :  { %p1446_p2 = por %p1445_p1, %p1444_p0 }
 0x3bc   :  { %p1447_p3 = pnand %p1446_p2, %p1440_p13 }
 0x3be   :  { %1450 = shalt.err (!%p1447_p3)
}
 0x3bf   :  { %s1451_s2 = scalar_lea.hbm %s1857_s6, 64 }
 0x3c0   :  { %p1452_p4 = scmp.ne.s32.totalorder %s1857_s6, %s1451_s2  ;;  %p1455_p5 = scmp.lt.u32.totalorder %s1451_s2, %s1857_s6 }
 0x3c2   :  { %p1457_p6 = pnand %p1455_p5, %p1452_p4 }
 0x3c4   :  { %1460 = shalt.err (!%p1457_p6)
}
 0x3c5   :  { %1076 = dma.vmem_to_hbm [thread:$0]  %s1074_s14, 64, %s1857_s6, [#allocation14]   ;;  %v882_v5 = vadd.f32 %v881_v26, %v880_v24  ;;  %v901_v6 = vrot.slane %v900_v27, 2 }
 0x3c6   :  { %s1461_s21 = scalar_lea.vmem %s1088_s16, 64  ;;  %p1466_p8 = scmp.lt.s32.totalorder %s1088_s16, %s1088_s16 }
 0x3c7   :  { %p1462_p7 = scmp.ne.s32.totalorder %s1088_s16, %s1461_s21  ;;  %p1467_p9 = scmp.lt.s32.totalorder %s1461_s21, %s1461_s21 }
 0x3c9   :  { %p1468_p10 = por %p1467_p9, %p1466_p8 }
 0x3cb   :  { %p1469_p11 = pnand %p1468_p10, %p1462_p7 }
 0x3cd   :  { %1472 = shalt.err (!%p1469_p11)
}
 0x3ce   :  { %s1473_s23 = scalar_lea.hbm %s1859_s8, 64 }
 0x3cf   :  { %p1474_p12 = scmp.ne.s32.totalorder %s1859_s8, %s1473_s23  ;;  %p1477_p13 = scmp.lt.u32.totalorder %s1473_s23, %s1859_s8 }
 0x3d1   :  { %p1479_p0 = pnand %p1477_p13, %p1474_p12 }
 0x3d3   :  { %1482 = shalt.err (!%p1479_p0)
}
 0x3d4   :  { %1090 = dma.vmem_to_hbm [thread:$0]  %s1088_s16, 64, %s1859_s8, [#allocation17]   ;;  %v883_v28 = vrot.slane %v882_v5, 1  ;;  %v902_v29 = vadd.f32 %v901_v6, %v900_v27 }
 0x3d5   :  { %s1533_s10 = smov [#allocation21]   ;;  %s867_s12 = smov [#allocation8] }
 0x3d6   :  { %s1094_s11 = sshll.u32 %s1533_s10, 4  ;;  %s1095_s11 = int_to_ptr.vmem [resolvable:$true] %s1094_s11 }
 0x3d7   :  { %s1483_s13 = scalar_lea.vmem %s1095_s11, 64  ;;  %p1488_p2 = scmp.lt.s32.totalorder %s1095_s11, %s1095_s11 }
 0x3d8   :  { %p1484_p1 = scmp.ne.s32.totalorder %s1095_s11, %s1483_s13  ;;  %p1489_p3 = scmp.lt.s32.totalorder %s1483_s13, %s1483_s13 }
 0x3da   :  { %p1490_p4 = por %p1489_p3, %p1488_p2 }
 0x3dc   :  { %p1491_p5 = pnand %p1490_p4, %p1484_p1 }
 0x3de   :  { %1494 = shalt.err (!%p1491_p5)
}
 0x3df   :  { %s1495_s0 = scalar_lea.hbm %s1860_s9, 64 }
 0x3e0   :  { %p1496_p6 = scmp.ne.s32.totalorder %s1860_s9, %s1495_s0  ;;  %p1499_p7 = scmp.lt.u32.totalorder %s1495_s0, %s1860_s9 }
 0x3e2   :  { %p1501_p8 = pnand %p1499_p7, %p1496_p6 }
 0x3e4   :  { %1504 = shalt.err (!%p1501_p8)
}
 0x3e5   :  { %1097 = dma.vmem_to_hbm [thread:$0]  %s1095_s11, 64, %s1860_s9, [#allocation22]   ;;  %v884_v30 = vadd.f32 %v883_v28, %v882_v5  ;;  %v903_v31 = vrot.slane %v902_v29, 1 }
 0x3e6   :  { %s887_s27 = smov [#allocation10] }
 0x3e7   :  { %885 = vst [vmem:[%s867_s12] sm:$0x1] %v884_v30  ;;  %v904_v32 = vadd.f32 %v903_v31, %v902_v29 }
 0x3e9   :  { %905 = vst [vmem:[%s887_s27] sm:$0x1] %v904_v32 }
 0x3ee   :  { %v909_v33 = vld [vmem:[#allocation8] sm:$0x1] }
 0x3ef   :  { %911 = vst [vmem:[#allocation9] sm:$0x1] %v909_v33 }
 0x3f0   :  { %v915_v34 = vld [vmem:[#allocation10] sm:$0x1] }
 0x3f1   :  { %917 = vst [vmem:[#allocation11] sm:$0x1] %v915_v34 }
 0x3f6   :  { %v1004_v35 = vld [vmem:[#allocation9] sm:$0x1] }
 0x3f7   :  { %1005 = vst [vmem:[%s1855_s4] sm:$0x1] %v1004_v35 }
 0x3f8   :  { %v1068_v36 = vld [vmem:[#allocation11] sm:$0x1] }
 0x3f9   :  { %1069 = vst [vmem:[%s1856_s5] sm:$0x1] %v1068_v36 }
 0x3fa   :  { %1513 = dma.done.wait [#allocation14], 64  }
 0x3fb   :  { %1514 = vsyncadd [#allocation14], 4294967232 }
 0x3fc   :  { %1515 = dma.done.wait [#allocation17], 128  }
 0x3fd   :  { %1516 = vsyncadd [#allocation17], 4294967168 }
 0x3fe   :  { %1517 = dma.done.wait [#allocation22], 64  }
 0x3ff   :  { %1518 = vsyncadd [#allocation22], 4294967232 }
 0x400   :  { %1106 = vsyncpa [#allocation14], 1 }
 0x401   :  { %1107 = vsyncpa [#allocation17], 1 }
 0x402   :  { %1108 = vsyncpa [#allocation22], 1 }

// kernel: batch_nuclear_norm_maximization.1
= control target key start
LH: loop header
LB: loop body
LE: loop exit
PB: predicated region body
PF: predicated region fallthrough
CT: control target
= control target key end

     0   :  { %9 = vsyncpa [#allocation3], 0  ;;  %s367_s0 = inlined_call_operand.hbm [shape: f32[8,32], index: 0, kind: input, shape index: {}]   ;;  %s368_s1 = inlined_call_operand.hbm [shape: f32[8,32], index: 1, kind: input, shape index: {}]   ;;  %s369_s2 = inlined_call_operand.vmem [shape: f32[8,8], index: 2, kind: output, shape index: {0}]   ;;  %s370_s3 = inlined_call_operand.vmem [shape: f32[8,8], index: 3, kind: output, shape index: {1}]  }
   0x1   :  { %10 = vsyncpa [#allocation5], 0  ;;  %s305_s12 = smov [#allocation2]   ;;  %s306_s14 = smov [#allocation4]  }
   0x2   :  { %s17_s13 = sshll.u32 %s305_s12, 4  ;;  %s27_s15 = sshll.u32 %s306_s14, 4  ;;  %s18_s13 = int_to_ptr.vmem [resolvable:$true] %s17_s13  ;;  %s28_s15 = int_to_ptr.vmem [resolvable:$true] %s27_s15 }
   0x3   :  { %s257_s18 = scalar_lea.hbm %s367_s0, 128 }
   0x4   :  { %p258_p0 = scmp.ne.s32.totalorder %s367_s0, %s257_s18  ;;  %p261_p1 = scmp.lt.u32.totalorder %s257_s18, %s367_s0 }
   0x6   :  { %p263_p2 = pnand %p261_p1, %p258_p0 }
   0x8   :  { %266 = shalt.err (!%p263_p2)
}
   0x9   :  { %s267_s23 = scalar_lea.vmem %s18_s13, 128  ;;  %p272_p4 = scmp.lt.s32.totalorder %s18_s13, %s18_s13 }
   0xa   :  { %p268_p3 = scmp.ne.s32.totalorder %s18_s13, %s267_s23  ;;  %p273_p5 = scmp.lt.s32.totalorder %s267_s23, %s267_s23 }
   0xc   :  { %p274_p6 = por %p273_p5, %p272_p4 }
   0xe   :  { %p275_p7 = pnand %p274_p6, %p268_p3 }
  0x10   :  { %278 = shalt.err (!%p275_p7)
}
  0x11   :  { %20 = dma.hbm_to_vmem [thread:$0]  %s367_s0, 128, %s18_s13, [#allocation3]  }
  0x12   :  { %s279_s28 = scalar_lea.hbm %s368_s1, 128 }
  0x13   :  { %p280_p8 = scmp.ne.s32.totalorder %s368_s1, %s279_s28  ;;  %p283_p9 = scmp.lt.u32.totalorder %s279_s28, %s368_s1 }
  0x15   :  { %p285_p10 = pnand %p283_p9, %p280_p8 }
  0x17   :  { %288 = shalt.err (!%p285_p10)
}
  0x18   :  { %s289_s6 = scalar_lea.vmem %s28_s15, 128  ;;  %p294_p12 = scmp.lt.s32.totalorder %s28_s15, %s28_s15 }
  0x19   :  { %p290_p11 = scmp.ne.s32.totalorder %s28_s15, %s289_s6  ;;  %p295_p13 = scmp.lt.s32.totalorder %s289_s6, %s289_s6 }
  0x1b   :  { %p296_p0 = por %p295_p13, %p294_p12 }
  0x1d   :  { %p297_p1 = pnand %p296_p0, %p290_p11 }
  0x1f   :  { %300 = shalt.err (!%p297_p1)
}
  0x20   :  { %30 = dma.hbm_to_vmem [thread:$0]  %s368_s1, 128, %s28_s15, [#allocation5]  }
  0x21   :  { %301 = dma.done.wait [#allocation3], 128  }
  0x22   :  { %302 = vsyncadd [#allocation3], 4294967168 }
  0x23   :  { %303 = dma.done.wait [#allocation5], 128  }
  0x24   :  { %304 = vsyncadd [#allocation5], 4294967168  ;;  %vm38_vm0 = vcmask 261120   ;;  %v37_v0 = vld [vmem:[#allocation2] sm:$0xff]  ;;  %v128_v1 = vld [vmem:[#allocation4] sm:$0xff]  ;;  %v307_v14 = vmov 0.0  }
  0x25   :  { %v39_v2 = vsel %vm38_vm0, %v37_v0, -inf  ;;  %v129_v3 = vsel %vm38_vm0, %v128_v1, -inf  ;;  %235 = vmatprep.subr.mxu0 %v307_v14  ;;  %240 = vmatprep.subr.mxu1 %v307_v14  ;;  %vm308_vm1 = vmmov 0   ;;  %vm126_vm2 = vcmask 64512  }
  0x26   :  { %40 = vmax.xlane.f32.xlu0 %v39_v2  ;;  %237 = vmatprep.mubr.msk.f32.mxu0 %vm308_vm1, %v307_v14 }
  0x27   :  { %242 = vmatprep.mubr.msk.f32.mxu1 %vm308_vm1, %v307_v14 }
  0x2a   :  { %130 = vmax.xlane.f32.xlu0 %v129_v3 }
  0xb3   :  { %v41_v4 = vpop.xlane.xlu0 %40 }
  0xb4   :  { %v42_v5 = vsub.f32 %v37_v0, %v41_v4 }
  0xb6   :  { %v43_v6 = vmul.f32 1.442695, %v42_v5 }
  0xb7   :  { %v131_v7 = vpop.xlane.xlu0 %130 }
  0xb8   :  { %249 = vpow2.f32 %v43_v6  ;;  %v132_v8 = vsub.f32 %v128_v1, %v131_v7 }
  0xba   :  { %v133_v9 = vmul.f32 1.442695, %v132_v8 }
  0xbc   :  { %251 = vpow2.f32 %v133_v9 }
  0xc2   :  { %v250_v10 = vpop.eup %249 }
  0xc3   :  { %v45_v11 = vsel %vm38_vm0, %v250_v10, 0.0 }
  0xc4   :  { %46 = vadd.xlane.f32.xlu1 %v45_v11 }
  0xc6   :  { %v252_v12 = vpop.eup %251 }
  0xc7   :  { %v135_v13 = vsel %vm38_vm0, %v252_v12, 0.0 }
  0xc8   :  { %136 = vadd.xlane.f32.xlu1 %v135_v13 }
 0x151   :  { %v47_v15 = vpop.xlane.xlu1 %46 }
 0x152   :  { %253 = vrcp.f32 %v47_v15 }
 0x155   :  { %v137_v16 = vpop.xlane.xlu1 %136 }
 0x156   :  { %255 = vrcp.f32 %v137_v16 }
 0x15c   :  { %v254_v17 = vpop.eup %253 }
 0x15d   :  { %v49_v18 = vmul.f32 %v254_v17, %v47_v15 }
 0x15f   :  { %v50_v19 = vsub.f32 2.0, %v49_v18 }
 0x160   :  { %v256_v20 = vpop.eup %255 }
 0x161   :  { %v51_v21 = vmul.f32 %v254_v17, %v50_v19  ;;  %v139_v22 = vmul.f32 %v256_v20, %v137_v16 }
 0x163   :  { %v140_v23 = vsub.f32 2.0, %v139_v22  ;;  %v52_v24 = vmul.f32 %v250_v10, %v51_v21 }
 0x165   :  { %v141_v25 = vmul.f32 %v256_v20, %v140_v23  ;;  %236 = vmatpush3.xpose.msk.msra.mxu0 %vm38_vm0, %v52_v24 }
 0x167   :  { %v142_v26 = vmul.f32 %v252_v12, %v141_v25 }
 0x168   :  { %238 = vmatmul.mubr.msk.f32.vlgmr.msra.gmra.mrb[0].mxu0 %vm38_vm0, %v52_v24 }
 0x169   :  { %241 = vmatpush3.xpose.msk.msra.mxu1 %vm38_vm0, %v142_v26 }
 0x16c   :  { %243 = vmatmul.mubr.msk.f32.vlgmr.msra.gmra.mrb[0].mxu1 %vm38_vm0, %v142_v26 }
 0x23b   :  { %v122_v27 = vpop.f32.mrb[0].mxu0 }
 0x23c   :  { %127 = vst.msk [vmem:[%s369_s2] sm:$0xff] %vm126_vm2, %v122_v27  ;;  %v239_v28 = vpop.f32.mrb[1].mxu0 }
 0x23f   :  { %v212_v29 = vpop.f32.mrb[0].mxu1 }
 0x240   :  { %216 = vst.msk [vmem:[%s370_s3] sm:$0xff] %vm126_vm2, %v212_v29  ;;  %v244_v30 = vpop.f32.mrb[1].mxu1 }
 0x241   :  { %225 = vsyncpa [#allocation3], 1 }
 0x242   :  { %226 = vsyncpa [#allocation5], 1 }

</bundles_post_ra>
